<compile_context>
chip_gen: v6e
topology: v6e:2x2x1
jax: 0.10.0
libtpu: 0.0.40
codegen_flags: <defaults>
</compile_context>

<pallas_src>
import jax
import jax.numpy as jnp
import numpy as np
from jax.experimental import pallas as pl
from jax.experimental.pallas import tpu as pltpu


def _round_up(x, m):
    return ((x + m - 1) // m) * m


def _fake_adj_kernel(src_ref, dst_ref, brow_ref, bcol_ref, out_ref, acc_ref):
    """One (i, j) tile of the complement ("fake") adjacency mask.

    Grid = (N/tn, N/tn, E/tk); k (edge) axis is the reduction axis.
    acc_ref accumulates the per-tile edge-count matrix in f32; at the last k
    step the same-graph / no-self-loop masks are applied and the int8 tile is
    written out lane-dense.
    """
    tm, tn = acc_ref.shape
    tk = src_ref.shape[1]
    i = pl.program_id(0)
    j = pl.program_id(1)
    k = pl.program_id(2)

    @pl.when(k == 0)
    def _():
        acc_ref[...] = jnp.zeros_like(acc_ref)

    row0 = i * tm          # first global node id covered by this row tile
    col0 = j * tn          # first global node id covered by this col tile

    src = src_ref[...]     # (1, tk)  int32, padded with -1 (matches no node)
    dst = dst_ref[...]     # (tk, 1)  int32, padded with -1

    # bf16 one-hots (exact 0/1 values; accumulation stays f32 so counts are
    # exact) keep the MXU on its native bf16 path on all generations.
    row_ids = row0 + jax.lax.broadcasted_iota(jnp.int32, (tm, tk), 0)
    src_oh = (row_ids == src).astype(jnp.bfloat16)                 # (tm, tk)
    col_ids = col0 + jax.lax.broadcasted_iota(jnp.int32, (tk, tn), 1)
    dst_oh = (dst == col_ids).astype(jnp.bfloat16)                 # (tk, tn)

    # adj_tile[a, b] += #edges (row0+a -> col0+b): plain (m,k)@(k,n) matmul.
    acc_ref[...] += jnp.dot(src_oh, dst_oh, preferred_element_type=jnp.float32)

    @pl.when(k == pl.num_programs(2) - 1)
    def _():
        # Masks only materialized once per (i, j) block (finalize step).
        same_graph = bcol_ref[...] == brow_ref[...]                # (tm,1)==(1,tn)
        rr = row0 + jax.lax.broadcasted_iota(jnp.int32, (tm, tn), 0)
        cc = col0 + jax.lax.broadcasted_iota(jnp.int32, (tm, tn), 1)
        not_self = rr != cc
        out_ref[...] = (same_graph & not_self
                        & (acc_ref[...] < 0.5)).astype(out_ref.dtype)


def weighted_san_dummy_edge_encoder(edge_index, batch_vec, real_emb, fake_emb,
                                    *, tile_n=256, tile_k=512,
                                    max_fake_edges=None):
    """Returns (edge_attr_dummy, edge_attr_dummy_fake, edge_index_fake_padded, fake_adj).

    edge_index_fake_padded is (2, max_fake) int32, padded with -1 past the true
    number of fake edges (PyTorch returns a data-dependent (2, E_fake) tensor).
    """
    n = int(batch_vec.shape[0])
    e = int(edge_index.shape[1])

    # Embedding(1, emb_dim) looked up at index 0 is just the single table row:
    # pure passthrough, no kernel / DMAs needed.
    edge_attr_dummy = real_emb
    edge_attr_dummy_fake = fake_emb

    # Tile sizing: multiples of 128, clamped for small problems; defaults are
    # safe for v7x's 64 MiB physical / 32 MiB scoped VMEM (and v5e/v6e).
    tile_n = int(min(tile_n, _round_up(n, 128)))
    tile_k = int(min(tile_k, _round_up(max(e, 1), 128)))
    assert tile_n % 128 == 0 and tile_k % 128 == 0

    n_pad = _round_up(n, tile_n)
    e_pad = _round_up(max(e, 1), tile_k)

    ei = edge_index.astype(jnp.int32)
    # src as (1, E_pad) row, dst as (E_pad, 1) column so dst one-hot comes out
    # directly in (tk, tn) orientation (no transposed-RHS matmul, no XLU work).
    src = jnp.full((1, e_pad), -1, jnp.int32).at[0, :e].set(ei[0])
    dst = jnp.full((e_pad, 1), -1, jnp.int32).at[:e, 0].set(ei[1])

    bvec = batch_vec.astype(jnp.int32)
    # Distinct pad sentinels (-1 row vs -2 col) so padded rows/cols never
    # satisfy batch[i] == batch[j] -> padded region of fake_adj stays zero.
    brow = jnp.full((1, n_pad), -1, jnp.int32).at[0, :n].set(bvec)
    bcol = jnp.full((n_pad, 1), -2, jnp.int32).at[:n, 0].set(bvec)

    grid = (n_pad // tile_n, n_pad // tile_n, e_pad // tile_k)

    cost = pl.CostEstimate(
        flops=2 * n_pad * n_pad * e_pad,
        transcendentals=0,
        bytes_accessed=(n_pad * n_pad                       # int8 output
                        + 8 * e_pad * grid[0] * grid[1]     # edge tiles per (i,j)
                        + 8 * n_pad * max(grid[0], grid[1])),
    )

    fake_adj_pad = pl.pallas_call(
        _fake_adj_kernel,
        out_shape=jax.ShapeDtypeStruct((n_pad, n_pad), jnp.int8),
        grid_spec=pltpu.PrefetchScalarGridSpec(
            num_scalar_prefetch=0,
            grid=grid,
            in_specs=[
                pl.BlockSpec((1, tile_k), lambda i, j, k: (0, k)),    # src
                pl.BlockSpec((tile_k, 1), lambda i, j, k: (k, 0)),    # dst
                pl.BlockSpec((1, tile_n), lambda i, j, k: (0, j)),    # batch row strip
                pl.BlockSpec((tile_n, 1), lambda i, j, k: (i, 0)),    # batch col strip
            ],
            out_specs=pl.BlockSpec((tile_n, tile_n), lambda i, j, k: (i, j)),
            scratch_shapes=[pltpu.VMEM((tile_n, tile_n), jnp.float32)],
        ),
        compiler_params=pltpu.CompilerParams(
            dimension_semantics=("parallel", "parallel", "arbitrary"),
            vmem_limit_bytes=32 * 1024 * 1024,
        ),
        cost_estimate=cost,
    )(src, dst, brow, bcol)

    fake_adj = fake_adj_pad[:n, :n]

    # Data-dependent nonzero -> (2, E_fake) has no fixed shape; use a static
    # bound (worst case N*(N-1); pass a tighter max_fake_edges when the
    # per-graph sizes are known), padded with -1.
    max_fake = int(max_fake_edges) if max_fake_edges is not None else n * (n - 1)
    rows, cols = jnp.nonzero(fake_adj, size=max_fake, fill_value=-1)
    edge_index_fake = jnp.stack([rows, cols], axis=0).astype(jnp.int32)

    return edge_attr_dummy, edge_attr_dummy_fake, edge_index_fake, fake_adj


if __name__ == "__main__":
    key = jax.random.PRNGKey(0)
    k1, k2 = jax.random.split(key)

    emb_dim = 32
    # Embedding(num_embeddings=1, embedding_dim=emb_dim), torch default init ~ N(0, 1).
    real_emb = jax.random.normal(k1, (1, emb_dim), dtype=jnp.float32)
    fake_emb = jax.random.normal(k2, (1, emb_dim), dtype=jnp.float32)

    # Two graphs of 8 nodes each (N = 16), deterministic edge list per graph.
    n_per_graph = 8
    batch_vec = jnp.array([0] * n_per_graph + [1] * n_per_graph, dtype=jnp.int32)
    base_edges = np.array(
        [[0, 1], [1, 0], [1, 2], [2, 1], [2, 3], [3, 4], [4, 5], [5, 6], [6, 7], [7, 0]],
        dtype=np.int32,
    )
    edges = np.concatenate([base_edges, base_edges + n_per_graph], axis=0).T  # (2, 20)
    edge_index = jnp.asarray(edges)

    dummy, dummy_fake, edge_index_fake, fake_adj = jax.block_until_ready(
        weighted_san_dummy_edge_encoder(edge_index, batch_vec, real_emb, fake_emb)
    )

    # Pure-numpy reference of the negate_edge_index semantics.
    n = int(batch_vec.shape[0])
    adj_ref = np.zeros((n, n), dtype=np.int32)
    ei_np = np.asarray(edge_index)
    adj_ref[ei_np[0], ei_np[1]] = 1
    same_graph = np.asarray(batch_vec)[:, None] == np.asarray(batch_vec)[None, :]
    not_self = ~np.eye(n, dtype=bool)
    fake_ref = (same_graph & not_self & (adj_ref == 0)).astype(np.int8)

    assert fake_adj.shape == (n, n)
    assert np.array_equal(np.asarray(fake_adj), fake_ref), "fake adjacency mismatch"

    r_ref, c_ref = np.nonzero(fake_ref)
    n_fake = r_ref.shape[0]
    ei_fake = np.asarray(edge_index_fake)
    assert ei_fake.shape == (2, n * (n - 1))
    assert np.array_equal(ei_fake[0, :n_fake], r_ref), "fake edge rows mismatch"
    assert np.array_equal(ei_fake[1, :n_fake], c_ref), "fake edge cols mismatch"
    assert np.all(ei_fake[:, n_fake:] == -1), "padding mismatch"

    assert np.allclose(np.asarray(dummy), np.asarray(real_emb))
    assert np.allclose(np.asarray(dummy_fake), np.asarray(fake_emb))
    assert dummy.shape == (1, emb_dim) and dummy_fake.shape == (1, emb_dim)

    # TODO(synk): attack_mode branch (edge_attr.log / log1p / torch_sparse.coalesce
    # with data-dependent output size) is skipped; cfg.attack defaults make it a no-op.
    print("KERNEL_OK")
</pallas_src>

<mosaic_0001>
module attributes {stable_mosaic.version = 11 : i64} {
  func.func @_fake_adj_kernel(%arg0: i32, %arg1: i32, %arg2: i32, %arg3: memref<1x128xi32, #tpu.memory_space<vmem>>, %arg4: memref<128x1xi32, #tpu.memory_space<vmem>>, %arg5: memref<1x128xi32, #tpu.memory_space<vmem>>, %arg6: memref<128x1xi32, #tpu.memory_space<vmem>>, %arg7: memref<128x128xi8, #tpu.memory_space<vmem>>, %arg8: memref<128x128xf32, #tpu.memory_space<vmem>>) attributes {dimension_semantics = [#tpu.dimension_semantics<parallel>, #tpu.dimension_semantics<parallel>, #tpu.dimension_semantics<arbitrary>], iteration_bounds = array<i64: 1, 1, 1>, scalar_prefetch = 0 : i64, scratch_operands = 1 : i64, tpu.core_type = #tpu.core_type<tc>, window_params = [{transform_indices = @transform_0, window_bounds = array<i64: 1, 128>}, {transform_indices = @transform_1, window_bounds = array<i64: 128, 1>}, {transform_indices = @transform_2, window_bounds = array<i64: 1, 128>}, {transform_indices = @transform_3, window_bounds = array<i64: 128, 1>}, {transform_indices = @transform_4, window_bounds = array<i64: 128, 128>}]} {
    %c0_i32 = arith.constant 0 : i32
    %0 = arith.cmpi eq, %arg2, %c0_i32 : i32
    %1 = arith.extui %0 : i1 to i32
    %c0_i32_0 = arith.constant 0 : i32
    %2 = arith.cmpi ne, %1, %c0_i32_0 : i32
    scf.if %2 {
      %cst_11 = arith.constant 0.000000e+00 : f32
      %30 = vector.broadcast %cst_11 : f32 to vector<128x128xf32>
      %c0_12 = arith.constant 0 : index
      %c0_13 = arith.constant 0 : index
      %31 = vector.load %arg8[%c0_12, %c0_13] : memref<128x128xf32, #tpu.memory_space<vmem>>, vector<128x128xf32>
      tpu.vector_store %arg8[%c0_12, %c0_13], %30 {strides = array<i32>} : memref<128x128xf32, #tpu.memory_space<vmem>>, vector<128x128xf32>,
    } else {
    }
    %c128_i32 = arith.constant 128 : i32
    %3 = arith.muli %arg0, %c128_i32 : i32
    %c128_i32_1 = arith.constant 128 : i32
    %4 = arith.muli %arg1, %c128_i32_1 : i32
    %c0 = arith.constant 0 : index
    %c0_2 = arith.constant 0 : index
    %5 = vector.load %arg3[%c0, %c0_2] : memref<1x128xi32, #tpu.memory_space<vmem>>, vector<1x128xi32>
    %c0_3 = arith.constant 0 : index
    %c0_4 = arith.constant 0 : index
    %6 = vector.load %arg4[%c0_3, %c0_4] : memref<128x1xi32, #tpu.memory_space<vmem>>, vector<128x1xi32>
    %7 = tpu.iota {dimensions = array<i32: 0>} : vector<128x128xi32>
    %8 = vector.broadcast %3 : i32 to vector<128x128xi32>
    %9 = arith.addi %8, %7 : vector<128x128xi32>
    %10 = vector.broadcast %5 : vector<1x128xi32> to vector<128x128xi32>
    %11 = arith.cmpi eq, %9, %10 : vector<128x128xi32>
    %12 = arith.extui %11 : vector<128x128xi1> to vector<128x128xi32>
    %13 = arith.sitofp %12 : vector<128x128xi32> to vector<128x128xf32>
    %14 = arith.truncf %13 : vector<128x128xf32> to vector<128x128xbf16>
    %15 = tpu.iota {dimensions = array<i32: 1>} : vector<128x128xi32>
    %16 = vector.broadcast %4 : i32 to vector<128x128xi32>
    %17 = arith.addi %16, %15 : vector<128x128xi32>
    %18 = vector.broadcast %6 : vector<128x1xi32> to vector<128x128xi32>
    %19 = arith.cmpi eq, %18, %17 : vector<128x128xi32>
    %20 = arith.extui %19 : vector<128x128xi1> to vector<128x128xi32>
    %21 = arith.sitofp %20 : vector<128x128xi32> to vector<128x128xf32>
    %22 = arith.truncf %21 : vector<128x128xf32> to vector<128x128xbf16>
    %c0_5 = arith.constant 0 : index
    %c0_6 = arith.constant 0 : index
    %23 = vector.load %arg8[%c0_5, %c0_6] : memref<128x128xf32, #tpu.memory_space<vmem>>, vector<128x128xf32>
    %cst = arith.constant dense<0.000000e+00> : vector<128x128xf32>
    %24 = tpu.matmul %14, %22, %cst {dimension_numbers = #tpu.dot_dimension_numbers<[1], [0], [0], [1], [0, 0, 1, 1], [], []>} : vector<128x128xbf16>, vector<128x128xbf16>, vector<128x128xf32> -> vector<128x128xf32>
    %25 = arith.addf %23, %24 : vector<128x128xf32>
    %c0_7 = arith.constant 0 : index
    %c0_8 = arith.constant 0 : index
    %26 = vector.load %arg8[%c0_7, %c0_8] : memref<128x128xf32, #tpu.memory_space<vmem>>, vector<128x128xf32>
    tpu.vector_store %arg8[%c0_7, %c0_8], %25 {strides = array<i32>} : memref<128x128xf32, #tpu.memory_space<vmem>>, vector<128x128xf32>,
    %c0_i32_9 = arith.constant 0 : i32
    %27 = arith.cmpi eq, %arg2, %c0_i32_9 : i32
    %28 = arith.extui %27 : i1 to i32
    %c0_i32_10 = arith.constant 0 : i32
    %29 = arith.cmpi ne, %28, %c0_i32_10 : i32
    scf.if %29 {
      %c0_11 = arith.constant 0 : index
      %c0_12 = arith.constant 0 : index
      %30 = vector.load %arg6[%c0_11, %c0_12] : memref<128x1xi32, #tpu.memory_space<vmem>>, vector<128x1xi32>
      %c0_13 = arith.constant 0 : index
      %c0_14 = arith.constant 0 : index
      %31 = vector.load %arg5[%c0_13, %c0_14] : memref<1x128xi32, #tpu.memory_space<vmem>>, vector<1x128xi32>
      %32 = vector.broadcast %30 : vector<128x1xi32> to vector<128x128xi32>
      %33 = vector.broadcast %31 : vector<1x128xi32> to vector<128x128xi32>
      %34 = arith.cmpi eq, %32, %33 : vector<128x128xi32>
      %35 = tpu.iota {dimensions = array<i32: 0>} : vector<128x128xi32>
      %36 = vector.broadcast %3 : i32 to vector<128x128xi32>
      %37 = arith.addi %36, %35 : vector<128x128xi32>
      %38 = tpu.iota {dimensions = array<i32: 1>} : vector<128x128xi32>
      %39 = vector.broadcast %4 : i32 to vector<128x128xi32>
      %40 = arith.addi %39, %38 : vector<128x128xi32>
      %41 = arith.cmpi ne, %37, %40 : vector<128x128xi32>
      %42 = arith.andi %34, %41 : vector<128x128xi1>
      %c0_15 = arith.constant 0 : index
      %c0_16 = arith.constant 0 : index
      %43 = vector.load %arg8[%c0_15, %c0_16] : memref<128x128xf32, #tpu.memory_space<vmem>>, vector<128x128xf32>
      %cst_17 = arith.constant 5.000000e-01 : f32
      %44 = vector.broadcast %cst_17 : f32 to vector<128x128xf32>
      %45 = arith.cmpf olt, %43, %44 : vector<128x128xf32>
      %46 = arith.andi %42, %45 : vector<128x128xi1>
      %47 = arith.extui %46 : vector<128x128xi1> to vector<128x128xi8>
      %c0_18 = arith.constant 0 : index
      %c0_19 = arith.constant 0 : index
      %48 = vector.load %arg7[%c0_18, %c0_19] : memref<128x128xi8, #tpu.memory_space<vmem>>, vector<128x128xi8>
      tpu.vector_store %arg7[%c0_18, %c0_19], %47 {strides = array<i32>} : memref<128x128xi8, #tpu.memory_space<vmem>>, vector<128x128xi8>,
    } else {
    }
    return
  }
  func.func @transform_0(%arg0: i32, %arg1: i32, %arg2: i32) -> (i32, i32) {
    %c0_i32 = arith.constant 0 : i32
    %c0_i32_0 = arith.constant 0 : i32
    return %c0_i32, %arg2 : i32, i32
  }
  func.func @transform_1(%arg0: i32, %arg1: i32, %arg2: i32) -> (i32, i32) {
    %c0_i32 = arith.constant 0 : i32
    %c0_i32_0 = arith.constant 0 : i32
    return %arg2, %c0_i32 : i32, i32
  }
  func.func @transform_2(%arg0: i32, %arg1: i32, %arg2: i32) -> (i32, i32) {
    %c0_i32 = arith.constant 0 : i32
    %c0_i32_0 = arith.constant 0 : i32
    return %c0_i32, %arg1 : i32, i32
  }
  func.func @transform_3(%arg0: i32, %arg1: i32, %arg2: i32) -> (i32, i32) {
    %c0_i32 = arith.constant 0 : i32
    %c0_i32_0 = arith.constant 0 : i32
    return %arg0, %c0_i32 : i32, i32
  }
  func.func @transform_4(%arg0: i32, %arg1: i32, %arg2: i32) -> (i32, i32) {
    %c0_i32 = arith.constant 0 : i32
    return %arg0, %arg1 : i32, i32
  }
}

</mosaic_0001>

<bundles_post_ra>
// kernel: tpu_custom_call.1
= control target key start
LH: loop header
LB: loop body
LE: loop exit
PB: predicated region body
PF: predicated region fallthrough
CT: control target
= control target key end

     0   :  { %v770_v2 = vmov 0   ;;  %s1312_s0 = inlined_call_operand.vmem [shape: s32[1,128], index: 0, kind: input, shape index: {}]   ;;  %s1313_s1 = inlined_call_operand.vmem [shape: s32[128,1], index: 1, kind: input, shape index: {}]   ;;  %s1314_s2 = inlined_call_operand.vmem [shape: s32[1,128], index: 2, kind: input, shape index: {}]   ;;  %s1315_s3 = inlined_call_operand.vmem [shape: s32[128,1], index: 3, kind: input, shape index: {}]   ;;  %s1316_s4 = inlined_call_operand.hbm [shape: s8[128,128], index: 4, kind: output, shape index: {}]  }
   0x1   :  { %v58_v0 = vld [vmem:[%s1313_s1 + $0x70] sm:$0xff]  ;;  %v56_v1 = vld [vmem:[%s1313_s1 + $0x60] sm:$0xff]  ;;  %747 = vset.pattern.permute.xlu1 %v770_v2  ;;  %746 = vset.pattern.permute.xlu0 %v770_v2  ;;  %v59_v3 = vld [vmem:[%s1313_s1 + $0x78] sm:$0xff] }
   0x2   :  { %201 = vperm.xlu0 %746, %v58_v0   ;;  %195 = vperm.xlu1 %747, %v56_v1   ;;  %v57_v4 = vld [vmem:[%s1313_s1 + $0x68] sm:$0xff]  ;;  %v55_v5 = vld [vmem:[%s1313_s1 + $0x58] sm:$0xff]  ;;  %v54_v6 = vld [vmem:[%s1313_s1 + $0x50] sm:$0xff] }
   0x6   :  { %204 = vperm.xlu0 %746, %v59_v3   ;;  %198 = vperm.xlu1 %747, %v57_v4  }
   0xa   :  { %192 = vperm.xlu1 %747, %v55_v5   ;;  %189 = vperm.xlu0 %746, %v54_v6  }
   0xb   :  { %9 = vsyncpa [#allocation4], 0  ;;  %v53_v7 = vld [vmem:[%s1313_s1 + $0x48] sm:$0xff]  ;;  %v52_v8 = vld [vmem:[%s1313_s1 + $0x40] sm:$0xff]  ;;  %v60_v15 = vlaneseq  ;;  %v771_v31 = vmov 1.0|1.0  }
   0xc   :  { %v51_v9 = vld [vmem:[%s1313_s1 + $0x38] sm:$0xff]  ;;  %v50_v10 = vld [vmem:[%s1313_s1 + $0x30] sm:$0xff]  ;;  %v49_v11 = vld [vmem:[%s1313_s1 + $0x28] sm:$0xff]  ;;  %v1347_v48 = vmov 0  ;;  %v1349_v49 = vmov 0 }
   0xd   :  { %v48_v12 = vld [vmem:[%s1313_s1 + $0x20] sm:$0xff]  ;;  %v47_v13 = vld [vmem:[%s1313_s1 + $0x18] sm:$0xff]  ;;  %v46_v14 = vld [vmem:[%s1313_s1 + $0x10] sm:$0xff]  ;;  %v851_v18 = vshrl.u32 %v60_v15, 7  ;;  %v992_v60 = vand.u32 127, %v60_v15 }
   0xe   :  { %186 = vperm.xlu1 %747, %v53_v7   ;;  %183 = vperm.xlu0 %746, %v52_v8   ;;  %v45_v16 = vld [vmem:[%s1313_s1 + $0x8] sm:$0xff]  ;;  %v44_v17 = vld [vmem:[%s1313_s1] sm:$0xff]  ;;  %v413_v29 = vld [vmem:[%s1315_s3 + $0x18] sm:$0xff] }
   0xf   :  { %v411_v19 = vld [vmem:[%s1315_s3 + $0x8] sm:$0xff]  ;;  %v410_v20 = vld [vmem:[%s1315_s3] sm:$0xff]  ;;  %v860_v21 = vadd.s32 8, %v851_v18  ;;  %v863_v22 = vadd.s32 24, %v851_v18  ;;  %v866_v23 = vadd.s32 64, %v851_v18  ;;  %v869_v24 = vadd.s32 72, %v851_v18 }
  0x10   :  { %v872_v25 = vadd.s32 16, %v851_v18  ;;  %v611_v26 = vld [vmem:[%s1312_s0] ss:$0 sm:$0xff]  ;;  %v878_v27 = vadd.s32 80, %v851_v18  ;;  %v881_v28 = vadd.s32 88, %v851_v18  ;;  %v412_v30 = vld [vmem:[%s1315_s3 + $0x10] sm:$0xff] }
  0x11   :  { %vm98_vm0 = vcmp.eq.s32.totalorder %v851_v18, %v611_v26  ;;  %vm99_vm1 = vcmp.eq.s32.totalorder %v860_v21, %v611_v26  ;;  %vm106_vm3 = vcmp.eq.s32.totalorder %v866_v23, %v611_v26  ;;  %vm107_vm4 = vcmp.eq.s32.totalorder %v869_v24, %v611_v26  ;;  %v415_v34 = vld [vmem:[%s1315_s3 + $0x28] sm:$0xff]  ;;  %v414_v35 = vld [vmem:[%s1315_s3 + $0x20] sm:$0xff]  ;;  %v417_v44 = vld [vmem:[%s1315_s3 + $0x38] sm:$0xff] }
  0x12   :  { %180 = vperm.xlu1 %747, %v51_v9   ;;  %177 = vperm.xlu0 %746, %v50_v10   ;;  %vm660_vm2 = vmpackc.low %vm99_vm1, %vm98_vm0  ;;  %vm100_vm5 = vcmp.eq.s32.totalorder %v872_v25, %v611_v26  ;;  %vm101_vm7 = vcmp.eq.s32.totalorder %v863_v22, %v611_v26  ;;  %vm108_vm8 = vcmp.eq.s32.totalorder %v878_v27, %v611_v26  ;;  %v914_v36 = vadd.s32 40, %v851_v18  ;;  %v416_v45 = vld [vmem:[%s1315_s3 + $0x30] sm:$0xff]  ;;  %v419_v50 = vld [vmem:[%s1315_s3 + $0x48] sm:$0xff] }
  0x13   :  { %709 = vmatprep.mubr.msk.bf16.mxu0 %vm660_vm2, %v771_v31  ;;  %vm668_vm6 = vmpackc.low %vm107_vm4, %vm106_vm3  ;;  %vm109_vm9 = vcmp.eq.s32.totalorder %v881_v28, %v611_v26  ;;  %v917_v37 = vadd.s32 32, %v851_v18  ;;  %v920_v38 = vadd.s32 56, %v851_v18  ;;  %v923_v39 = vadd.s32 96, %v851_v18  ;;  %v418_v51 = vld [vmem:[%s1315_s3 + $0x40] sm:$0xff]  ;;  %v421_v52 = vld [vmem:[%s1315_s3 + $0x58] sm:$0xff] }
  0x14   :  { %717 = vmatprep.mubr.msk.bf16.mxu1 %vm668_vm6, %v771_v31  ;;  %vm899_vm10 = vmpackc.low %vm101_vm7, %vm100_vm5  ;;  %v926_v40 = vadd.s32 104, %v851_v18  ;;  %v929_v41 = vadd.s32 48, %v851_v18  ;;  %v932_v42 = vadd.s32 112, %v851_v18  ;;  %v935_v43 = vadd.s32 120, %v851_v18  ;;  %v420_v53 = vld [vmem:[%s1315_s3 + $0x50] sm:$0xff]  ;;  %v423_v54 = vld [vmem:[%s1315_s3 + $0x68] sm:$0xff] }
  0x15   :  { %vm903_vm11 = vmpackc.low %vm109_vm9, %vm108_vm8  ;;  %vm102_vm12 = vcmp.eq.s32.totalorder %v917_v37, %v611_v26  ;;  %vm103_vm13 = vcmp.eq.s32.totalorder %v914_v36, %v611_v26  ;;  %vm110_vm15 = vcmp.eq.s32.totalorder %v923_v39, %v611_v26  ;;  %vm105_vm3 = vcmp.eq.s32.totalorder %v920_v38, %v611_v26  ;;  %v422_v55 = vld [vmem:[%s1315_s3 + $0x60] sm:$0xff]  ;;  %v425_v56 = vld [vmem:[%s1315_s3 + $0x78] sm:$0xff] }
  0x16   :  { %174 = vperm.xlu1 %747, %v49_v11   ;;  %171 = vperm.xlu0 %746, %v48_v12   ;;  %vm945_vm14 = vmpackc.low %vm103_vm13, %vm102_vm12  ;;  %vm111_vm0 = vcmp.eq.s32.totalorder %v926_v40, %v611_v26  ;;  %vm104_vm1 = vcmp.eq.s32.totalorder %v929_v41, %v611_v26  ;;  %vm112_vm4 = vcmp.eq.s32.totalorder %v932_v42, %v611_v26  ;;  %v424_v57 = vld [vmem:[%s1315_s3 + $0x70] sm:$0xff]  ;;  %v1069_v32 = vld [vmem:[%s1314_s2] ss:$0 sm:$0xff]  ;;  %s772_s2 = smov [#allocation3]  }
  0x17   :  { %vm952_vm2 = vmpackc.low %vm111_vm0, %vm110_vm15  ;;  %vm113_vm5 = vcmp.eq.s32.totalorder %v935_v43, %v611_v26  ;;  %s600_s27 = sshll.u32 %s772_s2, 4  ;;  %s601_s27 = int_to_ptr.vmem [resolvable:$true] %s600_s27 }
  0x18   :  { %vm959_vm6 = vmpackc.low %vm105_vm3, %vm104_vm1  ;;  %s748_s28 = scalar_lea.vmem %s601_s27, 512  ;;  %p753_p1 = scmp.lt.s32.totalorder %s601_s27, %s601_s27 }
  0x19   :  { %vm963_vm7 = vmpackc.low %vm113_vm5, %vm112_vm4  ;;  %p749_p0 = scmp.ne.s32.totalorder %s601_s27, %s748_s28  ;;  %p754_p2 = scmp.lt.s32.totalorder %s748_s28, %s748_s28 }
  0x1a   :  { %168 = vperm.xlu1 %747, %v47_v13   ;;  %165 = vperm.xlu0 %746, %v46_v14  }
  0x1b   :  { %p755_p3 = por %p754_p2, %p753_p1 }
  0x1d   :  { %p756_p4 = pnand %p755_p3, %p749_p0 }
  0x1e   :  { %162 = vperm.xlu1 %747, %v45_v16   ;;  %159 = vperm.xlu0 %746, %v44_v17  }
  0x22   :  { %431 = vperm.xlu1 %747, %v411_v19   ;;  %428 = vperm.xlu0 %746, %v410_v20  }
  0x26   :  { %437 = vperm.xlu1 %747, %v413_v29   ;;  %434 = vperm.xlu0 %746, %v412_v30  }
  0x2a   :  { %443 = vperm.xlu1 %747, %v415_v34   ;;  %440 = vperm.xlu0 %746, %v414_v35  }
  0x2e   :  { %449 = vperm.xlu1 %747, %v417_v44   ;;  %446 = vperm.xlu0 %746, %v416_v45   ;;  %v1345_v45 = vmov 0 }
  0x32   :  { %455 = vperm.xlu1 %747, %v419_v50   ;;  %452 = vperm.xlu0 %746, %v418_v51   ;;  %v1351_v50 = vmov 0 }
  0x36   :  { %461 = vperm.xlu1 %747, %v421_v52   ;;  %458 = vperm.xlu0 %746, %v420_v53   ;;  %v1356_v53 = vmov 0 }
  0x3a   :  { %467 = vperm.xlu1 %747, %v423_v54   ;;  %464 = vperm.xlu0 %746, %v422_v55  }
  0x3e   :  { %473 = vperm.xlu1 %747, %v425_v56   ;;  %470 = vperm.xlu0 %746, %v424_v57   ;;  %v1360_v56 = vmov 0 }
  0x7d   :  { %v202_v58 = vpop.permute.xlu0 %201  ;;  %v196_v59 = vpop.permute.xlu1 %195 }
  0x7e   :  { %vm220_vm8 = vcmp.eq.s32.totalorder %v202_v58, %v992_v60  ;;  %vm218_vm9 = vcmp.eq.s32.totalorder %v196_v59, %v992_v60  ;;  %v1372_v59 = vmov 0 }
  0x81   :  { %v205_v61 = vpop.permute.xlu0 %204  ;;  %v199_v62 = vpop.permute.xlu1 %198 }
  0x82   :  { %vm221_vm12 = vcmp.eq.s32.totalorder %v205_v61, %v992_v60  ;;  %vm219_vm13 = vcmp.eq.s32.totalorder %v199_v62, %v992_v60  ;;  %v1374_v61 = vmov 0 }
  0x83   :  { %vm644_vm15 = vmpackc.low %vm221_vm12, %vm220_vm8 }
  0x84   :  { %693 = vmatprep.subr.msk.bf16.mxu0 %vm644_vm15, %v771_v31  ;;  %725 = vmatprep.subr.msk.bf16.mxu1 %vm644_vm15, %v771_v31  ;;  %vm646_vm0 = vmpackc.low %vm219_vm13, %vm218_vm9 }
  0x85   :  { %694 = vmatpush3.bf16.msk.msra.mxu0 %vm644_vm15, %v771_v31  ;;  %733 = vmatpush3.bf16.msk.msra.mxu1 %vm644_vm15, %v771_v31  ;;  %v193_v63 = vpop.permute.xlu1 %192  ;;  %v190_v0 = vpop.permute.xlu0 %189 }
  0x86   :  { %vm217_vm1 = vcmp.eq.s32.totalorder %v193_v63, %v992_v60  ;;  %vm216_vm3 = vcmp.eq.s32.totalorder %v190_v0, %v992_v60  ;;  %695 = vmatprep.subr.msk.bf16.mxu0 %vm646_vm0, %v771_v31  ;;  %726 = vmatprep.subr.msk.bf16.mxu1 %vm646_vm0, %v771_v31  ;;  %v1384_v0 = vmov 0 }
  0x87   :  { %vm648_vm4 = vmpackc.low %vm217_vm1, %vm216_vm3 }
  0x89   :  { %696 = vmatpush3.bf16.msk.msra.mxu0 %vm646_vm0, %v771_v31  ;;  %734 = vmatpush3.bf16.msk.msra.mxu1 %vm646_vm0, %v771_v31  ;;  %v187_v1 = vpop.permute.xlu1 %186  ;;  %v184_v3 = vpop.permute.xlu0 %183 }
  0x8a   :  { %vm215_vm5 = vcmp.eq.s32.totalorder %v187_v1, %v992_v60  ;;  %vm214_vm8 = vcmp.eq.s32.totalorder %v184_v3, %v992_v60  ;;  %697 = vmatprep.subr.msk.bf16.mxu0 %vm648_vm4, %v771_v31  ;;  %727 = vmatprep.subr.msk.bf16.mxu1 %vm648_vm4, %v771_v31 }
  0x8b   :  { %vm650_vm9 = vmpackc.low %vm215_vm5, %vm214_vm8 }
  0x8d   :  { %698 = vmatpush3.bf16.msk.msra.mxu0 %vm648_vm4, %v771_v31  ;;  %735 = vmatpush3.bf16.msk.msra.mxu1 %vm648_vm4, %v771_v31  ;;  %v181_v4 = vpop.permute.xlu1 %180  ;;  %v178_v5 = vpop.permute.xlu0 %177 }
  0x8e   :  { %vm213_vm12 = vcmp.eq.s32.totalorder %v181_v4, %v992_v60  ;;  %vm212_vm13 = vcmp.eq.s32.totalorder %v178_v5, %v992_v60  ;;  %699 = vmatprep.subr.msk.bf16.mxu0 %vm650_vm9, %v771_v31  ;;  %728 = vmatprep.subr.msk.bf16.mxu1 %vm650_vm9, %v771_v31  ;;  %v1395_v4 = vmov 0 }
  0x8f   :  { %vm652_vm15 = vmpackc.low %vm213_vm12, %vm212_vm13 }
  0x91   :  { %700 = vmatpush3.bf16.msk.msra.mxu0 %vm650_vm9, %v771_v31  ;;  %736 = vmatpush3.bf16.msk.msra.mxu1 %vm650_vm9, %v771_v31  ;;  %v175_v6 = vpop.permute.xlu1 %174  ;;  %v172_v7 = vpop.permute.xlu0 %171 }
  0x92   :  { %vm211_vm0 = vcmp.eq.s32.totalorder %v175_v6, %v992_v60  ;;  %vm210_vm1 = vcmp.eq.s32.totalorder %v172_v7, %v992_v60  ;;  %701 = vmatprep.subr.msk.bf16.mxu0 %vm652_vm15, %v771_v31  ;;  %729 = vmatprep.subr.msk.bf16.mxu1 %vm652_vm15, %v771_v31  ;;  %v1401_v7 = vmov 0 }
  0x93   :  { %vm654_vm3 = vmpackc.low %vm211_vm0, %vm210_vm1  ;;  %vm503_vm0 = vcmp.ne.s32.totalorder %v866_v23, %v992_v60 }
  0x95   :  { %702 = vmatpush3.bf16.msk.msra.mxu0 %vm652_vm15, %v771_v31  ;;  %737 = vmatpush3.bf16.msk.msra.mxu1 %vm652_vm15, %v771_v31  ;;  %v169_v8 = vpop.permute.xlu1 %168  ;;  %v166_v9 = vpop.permute.xlu0 %165 }
  0x96   :  { %vm209_vm4 = vcmp.eq.s32.totalorder %v169_v8, %v992_v60  ;;  %vm208_vm5 = vcmp.eq.s32.totalorder %v166_v9, %v992_v60  ;;  %703 = vmatprep.subr.msk.bf16.mxu0 %vm654_vm3, %v771_v31  ;;  %730 = vmatprep.subr.msk.bf16.mxu1 %vm654_vm3, %v771_v31 }
  0x97   :  { %vm656_vm8 = vmpackc.low %vm209_vm4, %vm208_vm5  ;;  %vm506_vm4 = vcmp.ne.s32.totalorder %v881_v28, %v992_v60 }
  0x99   :  { %704 = vmatpush3.bf16.msk.msra.mxu0 %vm654_vm3, %v771_v31  ;;  %738 = vmatpush3.bf16.msk.msra.mxu1 %vm654_vm3, %v771_v31  ;;  %v163_v10 = vpop.permute.xlu1 %162  ;;  %v160_v11 = vpop.permute.xlu0 %159 }
  0x9a   :  { %vm207_vm9 = vcmp.eq.s32.totalorder %v163_v10, %v992_v60  ;;  %vm206_vm12 = vcmp.eq.s32.totalorder %v160_v11, %v992_v60  ;;  %705 = vmatprep.subr.msk.bf16.mxu0 %vm656_vm8, %v771_v31  ;;  %731 = vmatprep.subr.msk.bf16.mxu1 %vm656_vm8, %v771_v31 }
  0x9b   :  { %vm658_vm13 = vmpackc.low %vm207_vm9, %vm206_vm12 }
  0x9d   :  { %706 = vmatpush3.bf16.msk.msra.mxu0 %vm656_vm8, %v771_v31  ;;  %739 = vmatpush3.bf16.msk.msra.mxu1 %vm656_vm8, %v771_v31  ;;  %v429_v12 = vpop.permute.xlu0 %428  ;;  %v432_v13 = vpop.permute.xlu1 %431  ;;  %vm496_vm8 = vcmp.ne.s32.totalorder %v860_v21, %v992_v60 }
  0x9e   :  { %707 = vmatprep.subr.msk.bf16.mxu0 %vm658_vm13, %v771_v31  ;;  %732 = vmatprep.subr.msk.bf16.mxu1 %vm658_vm13, %v771_v31  ;;  %vm480_vm9 = vcmp.eq.s32.totalorder %v432_v13, %v1069_v32 }
  0xa1   :  { %708 = vmatpush3.bf16.msk.msra.mxu0 %vm658_vm13, %v771_v31  ;;  %740 = vmatpush3.bf16.msk.msra.mxu1 %vm658_vm13, %v771_v31  ;;  %v435_v14 = vpop.permute.xlu0 %434  ;;  %v438_v15 = vpop.permute.xlu1 %437  ;;  %vm505_vm13 = vcmp.ne.s32.totalorder %v878_v27, %v992_v60 }
  0xa4   :  { %710 = vmatmul.mubr.msk.bf16.vlgmr.msra.gmra.mxu0 %vm899_vm10, %v771_v31  ;;  %718 = vmatmul.mubr.msk.bf16.vlgmr.msra.gmra.mxu1 %vm903_vm11, %v771_v31  ;;  %vm495_vm10 = vcmp.ne.s32.totalorder %v851_v18, %v992_v60  ;;  %vm479_vm11 = vcmp.eq.s32.totalorder %v429_v12, %v1069_v32  ;;  %v1335_v18 = vmov 0 }
  0xa5   :  { %713 = vmatprep.mubr.msk.bf16.mxu0 %vm945_vm14, %v771_v31  ;;  %721 = vmatprep.mubr.msk.bf16.mxu1 %vm952_vm2, %v771_v31  ;;  %v1060_v16 = vpop.permute.xlu0 %440  ;;  %v1062_v17 = vpop.permute.xlu1 %443  ;;  %vm498_vm14 = vcmp.ne.s32.totalorder %v863_v22, %v992_v60  ;;  %vm482_vm2 = vcmp.eq.s32.totalorder %v438_v15, %v1069_v32  ;;  %vm1080_vm15 = vmand %vm479_vm11, %vm495_vm10 }
  0xa6   :  { %vm1087_vm3 = vmand %vm482_vm2, %vm498_vm14 }
  0xa7   :  { %v1336_v18 = vsel %vm1087_vm3, 4294967295, %v1335_v18  ;;  %vm1112_vm2 = vmand %vm480_vm9, %vm496_vm8 }
  0xa9   :  { %v447_v19 = vpop.permute.xlu0 %446  ;;  %v1064_v20 = vpop.permute.xlu1 %449 }
  0xac   :  { %714 = vmatmul.mubr.msk.bf16.gmra.mxu0 %vm959_vm6, %v771_v31  ;;  %722 = vmatmul.mubr.msk.bf16.gmra.mxu1 %vm963_vm7, %v771_v31  ;;  %vm497_vm6 = vcmp.ne.s32.totalorder %v872_v25, %v992_v60  ;;  %vm481_vm7 = vcmp.eq.s32.totalorder %v435_v14, %v1069_v32 }
  0xad   :  { %v453_v26 = vpop.permute.xlu0 %452  ;;  %v456_v29 = vpop.permute.xlu1 %455  ;;  %vm1097_vm12 = vmand %vm481_vm7, %vm497_vm6  ;;  %vm504_vm6 = vcmp.ne.s32.totalorder %v869_v24, %v992_v60  ;;  %v1353_v24 = vmov 0 }
  0xae   :  { %vm487_vm1 = vcmp.eq.s32.totalorder %v453_v26, %v1069_v32  ;;  %vm488_vm7 = vcmp.eq.s32.totalorder %v456_v29, %v1069_v32 }
  0xaf   :  { %vm1104_vm11 = vmand %vm487_vm1, %vm503_vm0 }
  0xb1   :  { %v459_v30 = vpop.permute.xlu0 %458  ;;  %v462_v31 = vpop.permute.xlu1 %461 }
  0xb2   :  { %vm490_vm5 = vcmp.eq.s32.totalorder %v462_v31, %v1069_v32  ;;  %vm489_vm10 = vcmp.eq.s32.totalorder %v459_v30, %v1069_v32 }
  0xb3   :  { %vm1108_vm14 = vmand %vm490_vm5, %vm506_vm4 }
  0xb4   :  { %vm521_vm3 = vmand %vm489_vm10, %vm505_vm13  ;;  %vm1355_vm13 = vnez %v1336_v18 }
  0xb5   :  { %v465_v33 = vpop.permute.xlu0 %464  ;;  %v1119_v27 = vpop.permute.xlu1 %467 }
  0xb9   :  { %v471_v44 = vpop.permute.xlu0 %470  ;;  %v474_v57 = vpop.permute.xlu1 %473 }
 0x164   :  { %v711_v21 = vpop.f32.mrf.mxu0  ;;  %v719_v28 = vpop.f32.mrf.mxu1 }
 0x165   :  { %vm545_vm0 = vcmp.lt.f32.partialorder %v711_v21, 0.5  ;;  %vm553_vm1 = vcmp.lt.f32.partialorder %v719_v28, 0.5 }
 0x166   :  { %vm1123_vm4 = vmand %vm1097_vm12, %vm545_vm0  ;;  %v312_v46 = vpop.f32.mrf.mxu0  ;;  %v344_v47 = vpop.f32.mrf.mxu1  ;;  %vm509_vm0 = vcmp.ne.s32.totalorder %v932_v42, %v992_v60  ;;  %v1370_v42 = vmov 0 }
 0x167   :  { %v1346_v45 = vsel %vm1123_vm4, 4294967295, %v1345_v45  ;;  %vm1127_vm5 = vmand %vm521_vm3, %vm553_vm1  ;;  %vm543_vm8 = vcmp.lt.f32.partialorder %v312_v46, 0.5  ;;  %vm551_vm9 = vcmp.lt.f32.partialorder %v344_v47, 0.5  ;;  %vm502_vm1 = vcmp.ne.s32.totalorder %v920_v38, %v992_v60 }
 0x168   :  { %v1348_v48 = vsel %vm1127_vm5, 4294967295, %v1347_v48  ;;  %vm1137_vm12 = vmand %vm488_vm7, %vm504_vm6  ;;  %v712_v51 = vpop.f32.mrf.mxu0  ;;  %v720_v52 = vpop.f32.mrf.mxu1  ;;  %vm1368_vm4 = vcmp.ne.s32.totalorder %v917_v37, %v992_v60  ;;  %vm1378_vm5 = vnez %v1346_v45 }
 0x169   :  { %v1350_v49 = vsel %vm1137_vm12, 4294967295, %v1349_v49  ;;  %vm1143_vm3 = vmand %vm1080_vm15, %vm543_vm8  ;;  %vm546_vm6 = vcmp.lt.f32.partialorder %v712_v51, 0.5  ;;  %vm507_vm8 = vcmp.ne.s32.totalorder %v923_v39, %v992_v60  ;;  %vm491_vm15 = vcmp.eq.s32.totalorder %v465_v33, %v1069_v32 }
 0x16a   :  { %v1352_v50 = vsel %vm1143_vm3, 4294967295, %v1351_v50  ;;  %vm1152_vm10 = vmand %vm1104_vm11, %vm551_vm9  ;;  %v315_v54 = vpop.f32.mrf.mxu0  ;;  %v347_v55 = vpop.f32.mrf.mxu1  ;;  %vm1358_vm11 = vcmp.ne.s32.totalorder %v929_v41, %v992_v60  ;;  %vm1359_vm9 = vcmp.eq.s32.totalorder %v447_v19, %v1069_v32  ;;  %v1363_v39 = vmov 0 }
 0x16b   :  { %v1354_v24 = vsel %vm1152_vm10, 4294967295, %v1353_v24  ;;  %vm1162_vm12 = vmand %vm1355_vm13, %vm546_vm6  ;;  %vm544_vm6 = vcmp.lt.f32.partialorder %v315_v54, 0.5  ;;  %vm1365_vm10 = vcmp.lt.f32.partialorder %v720_v52, 0.5  ;;  %v1366_v41 = vmov 0 }
 0x16c   :  { %v1357_v53 = vsel %vm1162_vm12, 4294967295, %v1356_v53  ;;  %vm1171_vm7 = vmand %vm1359_vm9, %vm1358_vm11  ;;  %vm486_vm11 = vcmp.eq.s32.totalorder %v1064_v20, %v1069_v32  ;;  %vm1362_vm9 = vcmp.eq.s32.totalorder %v471_v44, %v1069_v32  ;;  %v715_v38 = vpop.f32.mrf.mxu0  ;;  %v723_v58 = vpop.f32.mrf.mxu1  ;;  %vm1369_vm12 = vcmp.eq.s32.totalorder %v1060_v16, %v1069_v32 }
 0x16d   :  { %v1361_v56 = vsel %vm1171_vm7, 4294967295, %v1360_v56  ;;  %vm1191_vm7 = vmand %vm1362_vm9, %vm509_vm0  ;;  %vm510_vm0 = vcmp.ne.s32.totalorder %v935_v43, %v992_v60  ;;  %vm494_vm9 = vcmp.eq.s32.totalorder %v474_v57, %v1069_v32 }
 0x16e   :  { %v1364_v39 = vsel %vm1191_vm7, 4294967295, %v1363_v39  ;;  %vm1198_vm13 = vmand %vm1108_vm14, %vm1365_vm10  ;;  %v328_v37 = vpop.f32.mrf.mxu0  ;;  %vm1376_vm14 = vnez %v1352_v50  ;;  %vm1377_vm7 = vnez %v1357_v53  ;;  %v360_v43 = vpop.f32.mrf.mxu1 }
 0x16f   :  { %v1367_v41 = vsel %vm1198_vm13, 4294967295, %v1366_v41  ;;  %vm1208_vm3 = vmand %vm1369_vm12, %vm1368_vm4  ;;  %vm552_vm12 = vcmp.lt.f32.partialorder %v347_v55, 0.5 }
 0x170   :  { %v1371_v42 = vsel %vm1208_vm3, 4294967295, %v1370_v42  ;;  %vm1216_vm10 = vmand %vm491_vm15, %vm507_vm8  ;;  %vm500_vm8 = vcmp.ne.s32.totalorder %v914_v36, %v992_v60  ;;  %v716_v36 = vpop.f32.mrf.mxu0 }
 0x171   :  { %v1373_v59 = vsel %vm1216_vm10, 4294967295, %v1372_v59  ;;  %vm560_vm4 = vmand %vm1112_vm2, %vm544_vm6  ;;  %vm484_vm10 = vcmp.eq.s32.totalorder %v1062_v17, %v1069_v32 }
 0x172   :  { %vm1225_vm3 = vmand %vm486_vm11, %vm502_vm1  ;;  %vm1382_vm11 = vnez %v1350_v49  ;;  %v331_v6 = vpop.f32.mrf.mxu0 }
 0x173   :  { %v1375_v61 = vsel %vm1225_vm3, 4294967295, %v1374_v61  ;;  %vm575_vm15 = vmpackc.low %vm560_vm4, %vm1376_vm14  ;;  %vm549_vm4 = vcmp.lt.f32.partialorder %v715_v38, 0.5  ;;  %vm1383_vm3 = vnez %v1354_v24 }
 0x174   :  { %vm1379_vm2 = vmpackc.low %vm1377_vm7, %vm1378_vm5  ;;  %vm557_vm5 = vcmp.lt.f32.partialorder %v723_v58, 0.5 }
 0x175   :  { %vm577_vm6 = vmpackc.even %vm1379_vm2, %vm575_vm15  ;;  %vm1386_vm15 = vnez %v1367_v41 }
 0x176   :  { %vm1240_vm1 = vmand %vm494_vm9, %vm510_vm0  ;;  %v587_v63 = vsel %vm577_vm6, 16843009, %v770_v2  ;;  %vm508_vm0 = vcmp.ne.s32.totalorder %v926_v40, %v992_v60  ;;  %vm492_vm9 = vcmp.eq.s32.totalorder %v1119_v27, %v1069_v32  ;;  %v724_v40 = vpop.f32.mrf.mxu1 }
 0x177   :  { %vm568_vm14 = vmand %vm1382_vm11, %vm552_vm12  ;;  %591 = vst [vmem:[#allocation3] sm:$0xff] %v587_v63  ;;  %vm1387_vm12 = vnez %v1348_v48  ;;  %vm547_vm11 = vcmp.lt.f32.partialorder %v328_v37, 0.5 }
 0x178   :  { %vm581_vm13 = vmpackc.low %vm568_vm14, %vm1383_vm3  ;;  %vm1389_vm3 = vnez %v1361_v56  ;;  %vm1392_vm14 = vnez %v1364_v39  ;;  %v363_v8 = vpop.f32.mrf.mxu1 }
 0x179   :  { %vm1249_vm7 = vmand %vm484_vm10, %vm500_vm8  ;;  %vm555_vm8 = vcmp.lt.f32.partialorder %v360_v43, 0.5 }
 0x17a   :  { %v1385_v0 = vsel %vm1249_vm7, 4294967295, %v1384_v0  ;;  %vm1388_vm2 = vmpackc.low %vm1386_vm15, %vm1387_vm12  ;;  %vm550_vm15 = vcmp.lt.f32.partialorder %v716_v36, 0.5  ;;  %vm1397_vm12 = vnez %v1371_v42 }
 0x17b   :  { %vm583_vm6 = vmpackc.even %vm1388_vm2, %vm581_vm13  ;;  %vm1400_vm2 = vnez %v1373_v59 }
 0x17c   :  { %v589_v1 = vsel %vm583_vm6, 16843009, %v770_v2  ;;  %vm1265_vm10 = vmand %vm1389_vm3, %vm549_vm4  ;;  %vm1403_vm3 = vnez %v1375_v61 }
 0x17d   :  { %593 = vst [vmem:[#allocation3 + $0x10] sm:$0xff] %v589_v1  ;;  %vm1271_vm7 = vmand %vm1392_vm14, %vm557_vm5  ;;  %vm558_vm5 = vcmp.lt.f32.partialorder %v724_v40, 0.5  ;;  %vm548_vm14 = vcmp.lt.f32.partialorder %v331_v6, 0.5 }
 0x17e   :  { %vm1275_vm13 = vmand %vm492_vm9, %vm508_vm0 }
 0x17f   :  { %v1396_v4 = vsel %vm1275_vm13, 4294967295, %v1395_v4  ;;  %vm1281_vm4 = vmand %vm1397_vm12, %vm547_vm11  ;;  %vm556_vm13 = vcmp.lt.f32.partialorder %v363_v8, 0.5 }
 0x180   :  { %vm1287_vm6 = vmand %vm1400_vm2, %vm555_vm8  ;;  %vm1404_vm8 = vnez %v1385_v0 }
 0x181   :  { %v1402_v7 = vsel %vm1287_vm6, 4294967295, %v1401_v7  ;;  %vm566_vm0 = vmand %vm1403_vm3, %vm550_vm15 }
 0x182   :  { %vm579_vm9 = vmpackc.low %vm566_vm0, %vm1265_vm10  ;;  %vm1405_vm10 = vnez %v1396_v4 }
 0x183   :  { %vm574_vm11 = vmand %vm1240_vm1, %vm558_vm5  ;;  %vm1406_vm1 = vnez %v1402_v7 }
 0x184   :  { %vm585_vm12 = vmpackc.low %vm574_vm11, %vm1271_vm7 }
 0x185   :  { %vm564_vm2 = vmand %vm1404_vm8, %vm548_vm14 }
 0x186   :  { %vm578_vm6 = vmpackc.low %vm564_vm2, %vm1281_vm4 }
 0x187   :  { %vm580_vm15 = vmpackc.even %vm579_vm9, %vm578_vm6 }
 0x188   :  { %v588_v9 = vsel %vm580_vm15, 16843009, %v770_v2  ;;  %vm572_vm3 = vmand %vm1405_vm10, %vm556_vm13 }
 0x189   :  { %592 = vst [vmem:[#allocation3 + $0x8] sm:$0xff] %v588_v9  ;;  %vm584_vm5 = vmpackc.low %vm572_vm3, %vm1406_vm1 }
 0x18a   :  { %vm586_vm7 = vmpackc.even %vm585_vm12, %vm584_vm5 }
 0x18b   :  { %v590_v10 = vsel %vm586_vm7, 16843009, %v770_v2 }
 0x18c   :  { %594 = vst [vmem:[#allocation3 + $0x18] sm:$0xff] %v590_v10 }
 0x18d   :  { %759 = shalt.err (!%p756_p4)
}
 0x18e   :  { %s773_s29 = smov 128   ;;  %s774_s0 = smov 8  }
 0x18f   :  { %606 = dma.vmem_to_hbm [thread:$0]  %s601_s27, 512, %s1316_s4, [#allocation4], %s773_s29, %s773_s29, %s774_s0  }
 0x190   :  { %768 = dma.done.wait [#allocation4], 512  }
 0x191   :  { %769 = vsyncadd [#allocation4], 4294966784 }
 0x192   :  { %610 = vsyncpa [#allocation4], 1 }

</bundles_post_ra>
